<compile_context>
chip_gen: v6e
topology: v6e:2x2x1
jax: 0.10.0
libtpu: 0.0.40
codegen_flags: <defaults>
</compile_context>

<pallas_src>
import jax
import jax.numpy as jnp
from jax import lax
from jax.experimental import pallas as pl
from jax.experimental.pallas import tpu as pltpu

_LANES = 128
_VMEM_INPUT_BUDGET = 12 * 1024 * 1024   # bytes for the big double-buffered inputs
_VMEM_LIMIT = 32 * 1024 * 1024          # safe on v5e / v6e / v7x


# ---------------------------------------------------------------------------
# kernels
# ---------------------------------------------------------------------------
def _log_softmax(x):
    # numerically-stable log_softmax over the last (lane) dim
    m = jnp.max(x, axis=-1, keepdims=True)
    lse = jnp.log(jnp.sum(jnp.exp(x - m), axis=-1, keepdims=True)) + m
    return x - lse


def _sum_all(x):
    # (R, C) -> (1, 1): lane reduce first, then sublane reduce
    return jnp.sum(jnp.sum(x, axis=1, keepdims=True), axis=0, keepdims=True)


def _hard_partial(logp, labels):
    # -logp[row, label[row]] summed over the block, via one-hot (no gather).
    # Padded rows carry label == -1 and therefore contribute exactly 0.
    cls_idx = lax.broadcasted_iota(jnp.int32, logp.shape, 1)
    onehot = (cls_idx == labels).astype(jnp.float32)
    return _sum_all(-logp * onehot)                       # (1, 1)


def _ce_hard_kernel(logits_ref, labels_ref, hard_out):
    logp = _log_softmax(logits_ref[...].astype(jnp.float32))      # (TN, C)
    partial = _hard_partial(logp, labels_ref[...])                # (1, 1)
    hard_out[...] = jnp.broadcast_to(partial, (1, _LANES))        # lane-dense store


def _ce_soft_kernel(logits_ref, labels_ref, soft_ref, hard_out, soft_out):
    logp = _log_softmax(logits_ref[...].astype(jnp.float32))      # (TN, C)
    hard_out[...] = jnp.broadcast_to(_hard_partial(logp, labels_ref[...]), (1, _LANES))
    soft_partial = _sum_all(-logp * soft_ref[...].astype(jnp.float32))
    soft_out[...] = jnp.broadcast_to(soft_partial, (1, _LANES))


# ---------------------------------------------------------------------------
# wrapper
# ---------------------------------------------------------------------------
def _sublane(dtype):
    # f32 -> 8, bf16 -> 16, int8/fp8 -> 32
    return max(8, 32 // jnp.dtype(dtype).itemsize)


def _pick_tile(N, C, big_dtypes, max_block_rows=None):
    """VMEM-budgeted row tile. Returns (TN, padded_N)."""
    sub = max(_sublane(d) for d in big_dtypes)
    # double-buffered pipeline bytes per row of all big (N, C) inputs
    bytes_per_row = sum(2 * C * jnp.dtype(d).itemsize for d in big_dtypes)
    tn = _VMEM_INPUT_BUDGET // max(bytes_per_row, 1)
    tn = min(tn, 1024)                      # diminishing returns beyond ~1K rows
    if max_block_rows is not None:
        tn = min(tn, max_block_rows)
    tn = max(sub, (tn // sub) * sub)        # respect packed-dtype sublane tile
    n_pad_min = -(-N // sub) * sub
    tn = min(tn, n_pad_min)
    n_pad = -(-N // tn) * tn
    return tn, n_pad


def cross_entropy_pallas(logits, hardlabel, softlabel=None, softw=0.6,
                         block_rows=None):
    """Forward of CrossEntropy(softw). Returns a scalar float32 loss."""
    assert 0 <= softw < 1
    N, C = logits.shape
    labels2d = hardlabel.astype(jnp.int32).reshape(N, 1)

    big_dtypes = [logits.dtype] + ([softlabel.dtype] if softlabel is not None else [])
    tn, n_pad = _pick_tile(N, C, big_dtypes, max_block_rows=block_rows)
    grid = n_pad // tn

    if n_pad != N:
        pad = n_pad - N
        logits_p = jnp.pad(logits, ((0, pad), (0, 0)))
        labels_p = jnp.pad(labels2d, ((0, pad), (0, 0)), constant_values=-1)
    else:
        logits_p, labels_p = logits, labels2d

    out_shape_row = jax.ShapeDtypeStruct((1, grid * _LANES), jnp.float32)
    out_spec_row = pl.BlockSpec((1, _LANES), lambda i: (0, i))
    compiler_params = pltpu.CompilerParams(
        dimension_semantics=("parallel",),      # per-block partials: shardable
        vmem_limit_bytes=_VMEM_LIMIT,
    )

    if softlabel is None:
        # Specialized hard-only kernel: no zero-filled soft input is DMA'd.
        hard_rows = pl.pallas_call(
            _ce_hard_kernel,
            out_shape=out_shape_row,
            grid_spec=pltpu.PrefetchScalarGridSpec(
                num_scalar_prefetch=0,
                grid=(grid,),
                in_specs=[
                    pl.BlockSpec((tn, C), lambda i: (i, 0)),
                    pl.BlockSpec((tn, 1), lambda i: (i, 0)),
                ],
                out_specs=out_spec_row,
            ),
            compiler_params=compiler_params,
        )(logits_p, labels_p)
        hard_sum = hard_rows.reshape(grid, _LANES)[:, 0].sum()
        return hard_sum / N                      # F.nll_loss reduction='mean'

    assert softw, "Vanishing weight"
    soft_p = softlabel if n_pad == N else jnp.pad(softlabel, ((0, n_pad - N), (0, 0)))

    hard_rows, soft_rows = pl.pallas_call(
        _ce_soft_kernel,
        out_shape=(out_shape_row, out_shape_row),
        grid_spec=pltpu.PrefetchScalarGridSpec(
            num_scalar_prefetch=0,
            grid=(grid,),
            in_specs=[
                pl.BlockSpec((tn, C), lambda i: (i, 0)),
                pl.BlockSpec((tn, 1), lambda i: (i, 0)),
                pl.BlockSpec((tn, C), lambda i: (i, 0)),
            ],
            out_specs=(out_spec_row, out_spec_row),
        ),
        compiler_params=compiler_params,
    )(logits_p, labels_p, soft_p)

    loss = hard_rows.reshape(grid, _LANES)[:, 0].sum() / N
    item = soft_rows.reshape(grid, _LANES)[:, 0].sum() / N
    item = loss * (1.0 - softw) + item * softw
    # straight-through: forward value == hard loss, gradient path through `item`
    return item - lax.stop_gradient(item) + lax.stop_gradient(loss)


# ---------------------------------------------------------------------------
# pure-JAX reference
# ---------------------------------------------------------------------------
def cross_entropy_ref(logits, hardlabel, softlabel=None, softw=0.6):
    logp = jax.nn.log_softmax(logits.astype(jnp.float32), axis=-1)
    N = logits.shape[0]
    hard = -jnp.mean(logp[jnp.arange(N), hardlabel])
    if softlabel is None:
        return hard
    item = -(logp * softlabel.astype(jnp.float32)).sum(axis=-1).mean()
    item = hard * (1 - softw) + item * softw
    return item - lax.stop_gradient(item) + lax.stop_gradient(hard)


if __name__ == "__main__":
    key = jax.random.PRNGKey(0)
    k1, k2, k3 = jax.random.split(key, 3)

    N, C = 20, 32
    logits = jax.random.normal(k1, (N, C), dtype=jnp.float32)
    hardlabel = jax.random.randint(k2, (N,), 0, C, dtype=jnp.int32)
    softlabel = jax.nn.softmax(jax.random.normal(k3, (N, C), dtype=jnp.float32), axis=-1)

    # soft + hard mixing (single block, padded rows)
    out_soft = jax.block_until_ready(
        cross_entropy_pallas(logits, hardlabel, softlabel, softw=0.6))
    ref_soft = cross_entropy_ref(logits, hardlabel, softlabel, softw=0.6)
    assert jnp.allclose(out_soft, ref_soft, atol=1e-5, rtol=1e-5), (out_soft, ref_soft)

    # hard-label only (specialized kernel, no soft input DMA)
    out_hard = jax.block_until_ready(
        cross_entropy_pallas(logits, hardlabel, None, softw=0.6))
    ref_hard = cross_entropy_ref(logits, hardlabel, None, softw=0.6)
    assert jnp.allclose(out_hard, ref_hard, atol=1e-5, rtol=1e-5), (out_hard, ref_hard)

    # multi-block path with per-block partials (grid > 1, padded last block)
    out_multi = jax.block_until_ready(
        cross_entropy_pallas(logits, hardlabel, softlabel, softw=0.6, block_rows=8))
    assert jnp.allclose(out_multi, ref_soft, atol=1e-5, rtol=1e-5), (out_multi, ref_soft)

    # bf16 logits on the wire (sublane-16 tile), hard-only
    logits_bf16 = logits.astype(jnp.bfloat16)
    out_bf16 = jax.block_until_ready(
        cross_entropy_pallas(logits_bf16, hardlabel, None, softw=0.6))
    ref_bf16 = cross_entropy_ref(logits_bf16, hardlabel, None, softw=0.6)
    assert jnp.allclose(out_bf16, ref_bf16, atol=1e-5, rtol=1e-5), (out_bf16, ref_bf16)

    print("KERNEL_OK")
</pallas_src>

<mosaic_0001>
module attributes {stable_mosaic.version = 11 : i64} {
  func.func @_ce_soft_kernel(%arg0: i32, %arg1: memref<24x32xf32, #tpu.memory_space<vmem>>, %arg2: memref<24x1xi32, #tpu.memory_space<vmem>>, %arg3: memref<24x32xf32, #tpu.memory_space<vmem>>, %arg4: memref<1x128xf32, #tpu.memory_space<vmem>>, %arg5: memref<1x128xf32, #tpu.memory_space<vmem>>) attributes {dimension_semantics = [#tpu.dimension_semantics<parallel>], iteration_bounds = array<i64: 1>, scalar_prefetch = 0 : i64, scratch_operands = 0 : i64, tpu.core_type = #tpu.core_type<tc>, window_params = [{transform_indices = @transform_0, window_bounds = array<i64: 24, 32>}, {transform_indices = @transform_1, window_bounds = array<i64: 24, 1>}, {transform_indices = @transform_2, window_bounds = array<i64: 24, 32>}, {transform_indices = @transform_3, window_bounds = array<i64: 1, 128>}, {transform_indices = @transform_4, window_bounds = array<i64: 1, 128>}]} {
    %c0 = arith.constant 0 : index
    %c0_0 = arith.constant 0 : index
    %0 = vector.load %arg1[%c0, %c0_0] : memref<24x32xf32, #tpu.memory_space<vmem>>, vector<24x32xf32>
    %cst = arith.constant dense<0xFF800000> : vector<24xf32>
    %1 = vector.multi_reduction <maximumf>, %0, %cst [1] : vector<24x32xf32> to vector<24xf32>
    %2 = vector.shape_cast %1 : vector<24xf32> to vector<24x1xf32>
    %3 = vector.broadcast %2 : vector<24x1xf32> to vector<24x32xf32>
    %4 = arith.subf %0, %3 : vector<24x32xf32>
    %5 = math.exp %4 : vector<24x32xf32>
    %cst_1 = arith.constant dense<0.000000e+00> : vector<24xf32>
    %6 = vector.multi_reduction <add>, %5, %cst_1 [1] : vector<24x32xf32> to vector<24xf32>
    %7 = vector.shape_cast %6 : vector<24xf32> to vector<24x1xf32>
    %8 = math.log %7 : vector<24x1xf32>
    %9 = arith.addf %8, %2 : vector<24x1xf32>
    %10 = vector.broadcast %9 : vector<24x1xf32> to vector<24x32xf32>
    %11 = arith.subf %0, %10 : vector<24x32xf32>
    %c0_2 = arith.constant 0 : index
    %c0_3 = arith.constant 0 : index
    %12 = vector.load %arg2[%c0_2, %c0_3] : memref<24x1xi32, #tpu.memory_space<vmem>>, vector<24x1xi32>
    %13 = tpu.iota {dimensions = array<i32: 1>} : vector<24x32xi32>
    %14 = vector.broadcast %12 : vector<24x1xi32> to vector<24x32xi32>
    %15 = arith.cmpi eq, %13, %14 : vector<24x32xi32>
    %16 = arith.extui %15 : vector<24x32xi1> to vector<24x32xi32>
    %17 = arith.sitofp %16 : vector<24x32xi32> to vector<24x32xf32>
    %cst_4 = arith.constant 0.000000e+00 : f32
    %18 = vector.broadcast %cst_4 : f32 to vector<24x32xf32>
    %19 = arith.subf %18, %11 : vector<24x32xf32>
    %20 = arith.mulf %19, %17 : vector<24x32xf32>
    %cst_5 = arith.constant dense<0.000000e+00> : vector<24xf32>
    %21 = vector.multi_reduction <add>, %20, %cst_5 [1] : vector<24x32xf32> to vector<24xf32>
    %22 = vector.shape_cast %21 : vector<24xf32> to vector<24x1xf32>
    %cst_6 = arith.constant dense<0.000000e+00> : vector<1xf32>
    %23 = vector.multi_reduction <add>, %22, %cst_6 [0] : vector<24x1xf32> to vector<1xf32>
    %24 = vector.shape_cast %23 : vector<1xf32> to vector<1x1xf32>
    %25 = vector.shape_cast %24 : vector<1x1xf32> to vector<1x1xf32>
    %26 = vector.broadcast %25 : vector<1x1xf32> to vector<1x128xf32>
    %c0_7 = arith.constant 0 : index
    %c0_8 = arith.constant 0 : index
    %27 = vector.load %arg4[%c0_7, %c0_8] : memref<1x128xf32, #tpu.memory_space<vmem>>, vector<1x128xf32>
    tpu.vector_store %arg4[%c0_7, %c0_8], %26 {strides = array<i32>} : memref<1x128xf32, #tpu.memory_space<vmem>>, vector<1x128xf32>,
    %cst_9 = arith.constant 0.000000e+00 : f32
    %28 = vector.broadcast %cst_9 : f32 to vector<24x32xf32>
    %29 = arith.subf %28, %11 : vector<24x32xf32>
    %c0_10 = arith.constant 0 : index
    %c0_11 = arith.constant 0 : index
    %30 = vector.load %arg3[%c0_10, %c0_11] : memref<24x32xf32, #tpu.memory_space<vmem>>, vector<24x32xf32>
    %31 = arith.mulf %29, %30 : vector<24x32xf32>
    %cst_12 = arith.constant dense<0.000000e+00> : vector<24xf32>
    %32 = vector.multi_reduction <add>, %31, %cst_12 [1] : vector<24x32xf32> to vector<24xf32>
    %33 = vector.shape_cast %32 : vector<24xf32> to vector<24x1xf32>
    %cst_13 = arith.constant dense<0.000000e+00> : vector<1xf32>
    %34 = vector.multi_reduction <add>, %33, %cst_13 [0] : vector<24x1xf32> to vector<1xf32>
    %35 = vector.shape_cast %34 : vector<1xf32> to vector<1x1xf32>
    %36 = vector.shape_cast %35 : vector<1x1xf32> to vector<1x1xf32>
    %37 = vector.broadcast %36 : vector<1x1xf32> to vector<1x128xf32>
    %c0_14 = arith.constant 0 : index
    %c0_15 = arith.constant 0 : index
    %38 = vector.load %arg5[%c0_14, %c0_15] : memref<1x128xf32, #tpu.memory_space<vmem>>, vector<1x128xf32>
    tpu.vector_store %arg5[%c0_14, %c0_15], %37 {strides = array<i32>} : memref<1x128xf32, #tpu.memory_space<vmem>>, vector<1x128xf32>,
    return
  }
  func.func @transform_0(%arg0: i32) -> (i32, i32) {
    %c0_i32 = arith.constant 0 : i32
    %c0_i32_0 = arith.constant 0 : i32
    return %arg0, %c0_i32 : i32, i32
  }
  func.func @transform_1(%arg0: i32) -> (i32, i32) {
    %c0_i32 = arith.constant 0 : i32
    %c0_i32_0 = arith.constant 0 : i32
    return %arg0, %c0_i32 : i32, i32
  }
  func.func @transform_2(%arg0: i32) -> (i32, i32) {
    %c0_i32 = arith.constant 0 : i32
    %c0_i32_0 = arith.constant 0 : i32
    return %arg0, %c0_i32 : i32, i32
  }
  func.func @transform_3(%arg0: i32) -> (i32, i32) {
    %c0_i32 = arith.constant 0 : i32
    %c0_i32_0 = arith.constant 0 : i32
    return %c0_i32, %arg0 : i32, i32
  }
  func.func @transform_4(%arg0: i32) -> (i32, i32) {
    %c0_i32 = arith.constant 0 : i32
    %c0_i32_0 = arith.constant 0 : i32
    return %c0_i32, %arg0 : i32, i32
  }
}

</mosaic_0001>

<bundles_post_ra>
// kernel: tpu_custom_call.1
= control target key start
LH: loop header
LB: loop body
LE: loop exit
PB: predicated region body
PF: predicated region fallthrough
CT: control target
= control target key end

     0   :  { %10 = vsyncpa [#allocation3], 0  ;;  %s341_s0 = inlined_call_operand.vmem [shape: f32[24,32], index: 0, kind: input, shape index: {}]   ;;  %s342_s1 = inlined_call_operand.vmem [shape: s32[24,1], index: 1, kind: input, shape index: {}]   ;;  %s343_s2 = inlined_call_operand.hbm [shape: f32[24,32], index: 2, kind: input, shape index: {}]   ;;  %s344_s3 = inlined_call_operand.hbm [shape: f32[1,128], index: 3, kind: output, shape index: {0}]   ;;  %s345_s4 = inlined_call_operand.hbm [shape: f32[1,128], index: 4, kind: output, shape index: {1}]  }
   0x1   :  { %11 = vsyncpa [#allocation4], 0 }
   0x2   :  { %12 = vsyncpa [#allocation7], 0  ;;  %s265_s15 = smov [#allocation2]  }
   0x3   :  { %s22_s16 = sshll.u32 %s265_s15, 4  ;;  %s23_s16 = int_to_ptr.vmem [resolvable:$true] %s22_s16 }
   0x4   :  { %s207_s17 = scalar_lea.vmem %s23_s16, 384  ;;  %p212_p1 = scmp.lt.s32.totalorder %s23_s16, %s23_s16 }
   0x5   :  { %p208_p0 = scmp.ne.s32.totalorder %s23_s16, %s207_s17  ;;  %p213_p2 = scmp.lt.s32.totalorder %s207_s17, %s207_s17 }
   0x7   :  { %p214_p3 = por %p213_p2, %p212_p1 }
   0x9   :  { %p215_p4 = pnand %p214_p3, %p208_p0 }
   0xb   :  { %218 = shalt.err (!%p215_p4)
}
   0xc   :  { %s266_s18 = smov 128   ;;  %s267_s19 = smov 8  }
   0xd   :  { %28 = dma.hbm_to_vmem [thread:$0]  %s343_s2, 384, %s23_s16, [#allocation3], %s266_s18, %s266_s18, %s267_s19  }
   0xe   :  { %259 = dma.done.wait [#allocation3], 384  }
   0xf   :  { %260 = vsyncadd [#allocation3], 4294966912  ;;  %vm35_vm0 = vcmask 261120   ;;  %v32_v0 = vld [vmem:[%s341_s0] sm:$0xff]  ;;  %v33_v1 = vld [vmem:[%s341_s0 + $0x8] sm:$0xff]  ;;  %v268_v6 = vmov 0   ;;  %v78_v27 = vlaneseq }
  0x10   :  { %v309_v2 = vld [vmem:[%s341_s0 + $0x10] sm:$0xff]  ;;  %v36_v3 = vsel %vm35_vm0, %v32_v0, -inf  ;;  %v39_v5 = vsel %vm35_vm0, %v33_v1, -inf  ;;  %186 = vset.pattern.permute.xlu1 %v268_v6  ;;  %185 = vset.pattern.permute.xlu0 %v268_v6  ;;  %v76_v17 = vld [vmem:[%s342_s1 + $0x8] sm:$0xff]  ;;  %v75_v19 = vld [vmem:[%s342_s1] sm:$0xff]  ;;  %v269_v37 = vmov 0.0  }
  0x11   :  { %v42_v4 = vsel %vm35_vm0, %v309_v2, -inf  ;;  %37 = vmax.xlane.f32.xlu0 %v36_v3  ;;  %v77_v24 = vld [vmem:[%s342_s1 + $0x10] sm:$0xff]  ;;  %v79_v31 = vand.u32 127, %v78_v27  ;;  %v122_v41 = vld [vmem:[#allocation2] sm:$0xff]  ;;  %v123_v48 = vld [vmem:[#allocation2 + $0x8] sm:$0xff]  ;;  %s270_s1 = smov [#allocation5]  }
  0x12   :  { %43 = vmax.xlane.f32.xlu1 %v42_v4  ;;  %v124_v62 = vld [vmem:[#allocation2 + $0x10] sm:$0xff]  ;;  %s152_s6 = sshll.u32 %s270_s1, 4  ;;  %s271_s7 = smov [#allocation6]   ;;  %s153_s6 = int_to_ptr.vmem [resolvable:$true] %s152_s6 }
  0x13   :  { %s162_s8 = sshll.u32 %s271_s7, 4  ;;  %s219_s9 = scalar_lea.vmem %s153_s6, 16  ;;  %s163_s8 = int_to_ptr.vmem [resolvable:$true] %s162_s8 }
  0x14   :  { %p220_p5 = scmp.ne.s32.totalorder %s153_s6, %s219_s9  ;;  %s223_s10 = scalar_lea.vmem %s153_s6, 32 }
  0x15   :  { %40 = vmax.xlane.f32.xlu0 %v39_v5  ;;  %p224_p6 = scmp.lt.s32.totalorder %s153_s6, %s153_s6  ;;  %p225_p7 = scmp.lt.s32.totalorder %s223_s10, %s219_s9 }
  0x17   :  { %p226_p8 = por %p225_p7, %p224_p6 }
  0x19   :  { %p227_p9 = pnand %p226_p8, %p220_p5 }
  0x9a   :  { %v38_v7 = vpop.xlane.xlu0 %37 }
  0x9b   :  { %v45_v8 = vsub.f32 %v32_v0, %v38_v7  ;;  %v44_v18 = vpop.xlane.xlu1 %43 }
  0x9c   :  { %v47_v20 = vsub.f32 %v309_v2, %v44_v18 }
  0x9d   :  { %v48_v9 = vmul.f32 1.442695, %v45_v8 }
  0x9e   :  { %v41_v10 = vpop.xlane.xlu0 %40  ;;  %v52_v21 = vmul.f32 1.442695, %v47_v20 }
  0x9f   :  { %187 = vpow2.f32 %v48_v9  ;;  %v46_v11 = vsub.f32 %v33_v1, %v41_v10 }
  0xa1   :  { %v50_v12 = vmul.f32 1.442695, %v46_v11 }
  0xa3   :  { %189 = vpow2.f32 %v50_v12 }
  0xa4   :  { %191 = vpow2.f32 %v52_v21 }
  0xac   :  { %v188_v13 = vpop.eup %187 }
  0xad   :  { %v54_v14 = vsel %vm35_vm0, %v188_v13, 0.0 }
  0xae   :  { %55 = vadd.xlane.f32.xlu1 %v54_v14 }
  0xb0   :  { %v190_v15 = vpop.eup %189 }
  0xb1   :  { %v57_v16 = vsel %vm35_vm0, %v190_v15, 0.0  ;;  %v192_v22 = vpop.eup %191 }
  0xb2   :  { %58 = vadd.xlane.f32.xlu0 %v57_v16  ;;  %v60_v23 = vsel %vm35_vm0, %v192_v22, 0.0 }
  0xbf   :  { %84 = vperm.xlu1 %186, %v76_v17  }
  0xc8   :  { %81 = vperm.xlu0 %185, %v75_v19  }
  0xe3   :  { %61 = vadd.xlane.f32.xlu1 %v60_v23 }
  0xf4   :  { %87 = vperm.xlu1 %186, %v77_v24  }
 0x137   :  { %v56_v25 = vpop.xlane.xlu1 %55 }
 0x138   :  { %193 = vlog2.f32 %v56_v25 }
 0x13b   :  { %v59_v26 = vpop.xlane.xlu0 %58  ;;  %v85_v36 = vpop.permute.xlu1 %84 }
 0x13c   :  { %195 = vlog2.f32 %v59_v26  ;;  %vm90_vm2 = vcmp.eq.s32.totalorder %v79_v31, %v85_v36 }
 0x13d   :  { %v176_v47 = vsel %vm90_vm2, 1.0, %v269_v37 }
 0x143   :  { %v82_v29 = vpop.permute.xlu0 %81 }
 0x144   :  { %vm89_vm1 = vcmp.eq.s32.totalorder %v79_v31, %v82_v29 }
 0x145   :  { %v194_v28 = vpop.eup %193  ;;  %v175_v38 = vsel %vm89_vm1, 1.0, %v269_v37 }
 0x146   :  { %v64_v30 = vmul.f32 0.6931472, %v194_v28 }
 0x148   :  { %v69_v32 = vadd.f32 %v64_v30, %v38_v7 }
 0x149   :  { %v196_v33 = vpop.eup %195 }
 0x14a   :  { %v66_v34 = vmul.f32 0.6931472, %v196_v33  ;;  %v72_v35 = vsub.f32 %v32_v0, %v69_v32 }
 0x14c   :  { %v70_v39 = vadd.f32 %v66_v34, %v41_v10  ;;  %v98_v40 = vsub.f32 0.0, %v72_v35 }
 0x14e   :  { %v101_v42 = vmul.f32 %v175_v38, %v98_v40  ;;  %v73_v43 = vsub.f32 %v33_v1, %v70_v39  ;;  %v125_v46 = vmul.f32 %v122_v41, %v98_v40 }
 0x150   :  { %v104_v44 = vsel %vm35_vm0, %v101_v42, 0.0  ;;  %v99_v45 = vsub.f32 0.0, %v73_v43  ;;  %v128_v51 = vsel %vm35_vm0, %v125_v46, 0.0 }
 0x151   :  { %105 = vadd.xlane.f32.xlu1 %v104_v44 }
 0x152   :  { %v102_v49 = vmul.f32 %v176_v47, %v99_v45  ;;  %v126_v52 = vmul.f32 %v123_v48, %v99_v45 }
 0x154   :  { %v107_v50 = vsel %vm35_vm0, %v102_v49, 0.0  ;;  %v131_v53 = vsel %vm35_vm0, %v126_v52, 0.0 }
 0x155   :  { %108 = vadd.xlane.f32.xlu0 %v107_v50  ;;  %129 = vadd.xlane.f32.xlu1 %v128_v51 }
 0x159   :  { %132 = vadd.xlane.f32.xlu1 %v131_v53 }
 0x16c   :  { %v62_v54 = vpop.xlane.xlu1 %61 }
 0x16d   :  { %197 = vlog2.f32 %v62_v54 }
 0x170   :  { %v88_v57 = vpop.permute.xlu1 %87 }
 0x171   :  { %vm91_vm3 = vcmp.eq.s32.totalorder %v79_v31, %v88_v57 }
 0x172   :  { %v177_v61 = vsel %vm91_vm3, 1.0, %v269_v37 }
 0x17a   :  { %v198_v55 = vpop.eup %197 }
 0x17b   :  { %v68_v56 = vmul.f32 0.6931472, %v198_v55 }
 0x17d   :  { %v71_v58 = vadd.f32 %v68_v56, %v44_v18 }
 0x17f   :  { %v74_v59 = vsub.f32 %v309_v2, %v71_v58 }
 0x181   :  { %v100_v60 = vsub.f32 0.0, %v74_v59 }
 0x183   :  { %v103_v63 = vmul.f32 %v177_v61, %v100_v60  ;;  %v127_v1 = vmul.f32 %v124_v62, %v100_v60 }
 0x185   :  { %v110_v0 = vsel %vm35_vm0, %v103_v63, 0.0  ;;  %v134_v3 = vsel %vm35_vm0, %v127_v1, 0.0 }
 0x186   :  { %111 = vadd.xlane.f32.xlu1 %v110_v0 }
 0x18a   :  { %135 = vadd.xlane.f32.xlu1 %v134_v3 }
 0x1da   :  { %v106_v4 = vpop.xlane.xlu1 %105 }
 0x1de   :  { %v130_v5 = vpop.xlane.xlu1 %129  ;;  %v109_v6 = vpop.xlane.xlu0 %108 }
 0x1df   :  { %v113_v8 = vadd.f32 %v109_v6, %v106_v4 }
 0x1e2   :  { %v133_v7 = vpop.xlane.xlu1 %132 }
 0x1e3   :  { %v137_v11 = vadd.f32 %v133_v7, %v130_v5 }
 0x20f   :  { %v112_v9 = vpop.xlane.xlu1 %111 }
 0x210   :  { %v114_v10 = vadd.f32 %v113_v8, %v112_v9 }
 0x212   :  { %v115_v2 = vrot.slane %v114_v10, 4 }
 0x213   :  { %v136_v12 = vpop.xlane.xlu1 %135 }
 0x214   :  { %v116_v13 = vadd.f32 %v115_v2, %v114_v10  ;;  %v138_v14 = vadd.f32 %v137_v11, %v136_v12 }
 0x216   :  { %v117_v15 = vrot.slane %v116_v13, 2  ;;  %v139_v16 = vrot.slane %v138_v14, 4 }
 0x218   :  { %v118_v17 = vadd.f32 %v117_v15, %v116_v13  ;;  %v140_v18 = vadd.f32 %v139_v16, %v138_v14 }
 0x21a   :  { %v141_v19 = vrot.slane %v140_v18, 2  ;;  %v119_v20 = vrot.slane %v118_v17, 1 }
 0x21c   :  { %v142_v21 = vadd.f32 %v141_v19, %v140_v18  ;;  %v120_v22 = vadd.f32 %v119_v20, %v118_v17 }
 0x21e   :  { %121 = vst [vmem:[#allocation5] sm:$0x1] %v120_v22  ;;  %v143_v23 = vrot.slane %v142_v21, 1 }
 0x21f   :  { %230 = shalt.err (!%p227_p9)
}
 0x220   :  { %155 = dma.vmem_to_hbm [thread:$0]  %s153_s6, 16, %s344_s3, [#allocation4]   ;;  %v144_v24 = vadd.f32 %v143_v23, %v142_v21 }
 0x221   :  { %s239_s13 = scalar_lea.vmem %s163_s8, 16  ;;  %s243_s14 = scalar_lea.vmem %s163_s8, 32 }
 0x222   :  { %145 = vst [vmem:[#allocation6] sm:$0x1] %v144_v24  ;;  %p240_p10 = scmp.ne.s32.totalorder %s163_s8, %s239_s13  ;;  %p244_p11 = scmp.lt.s32.totalorder %s163_s8, %s163_s8 }
 0x223   :  { %p245_p12 = scmp.lt.s32.totalorder %s243_s14, %s239_s13 }
 0x225   :  { %p246_p13 = por %p245_p12, %p244_p11 }
 0x227   :  { %p247_p0 = pnand %p246_p13, %p240_p10 }
 0x229   :  { %250 = shalt.err (!%p247_p0)
}
 0x22a   :  { %165 = dma.vmem_to_hbm [thread:$0]  %s163_s8, 16, %s345_s4, [#allocation7]  }
 0x22b   :  { %261 = dma.done.wait [#allocation4], 16  }
 0x22c   :  { %262 = vsyncadd [#allocation4], 4294967280 }
 0x22d   :  { %263 = dma.done.wait [#allocation7], 16  }
 0x22e   :  { %264 = vsyncadd [#allocation7], 4294967280 }
 0x22f   :  { %172 = vsyncpa [#allocation3], 1 }
 0x230   :  { %173 = vsyncpa [#allocation4], 1 }
 0x231   :  { %174 = vsyncpa [#allocation7], 1 }

</bundles_post_ra>
